<compile_context>
chip_gen: v7x
topology: tpu7x:2x2x1
jax: 0.10.0
libtpu: 0.0.40
codegen_flags: <defaults>
</compile_context>

<pallas_src>
import functools
import math

import jax
import jax.numpy as jnp
from jax.experimental import pallas as pl
from jax.experimental.pallas import tpu as pltpu

SIGMA_INIT = 0.017
HIDDEN = 128
N_OBS = 2  # MountainCar-v0 observation dim


def noisy_dqn_kernel(x_ref, small_ref, big_ref, eps_w_ref, eps_b_ref, o_ref):
    """Fused NoisyDQN forward.

    small_ref: (8, 128) f32 rows =
        [w1T_row0, w1T_row1, b1, b2, b3, sigma_b3, b4_pad, sigma_b4_pad]
    big_ref:   (5, 128, 128) bf16 =
        [w2T, w3T, w4T_pad, sigma_w3T, sigma_w4T_pad]   (all stored as (in, out))
    eps_w_ref: (2, 128, 128) bf16 = [eps_w3T, eps_w4T]  (fresh each forward)
    eps_b_ref: (2, 128)      f32  = [eps_b3,  eps_b4_pad]
    """
    x = x_ref[...]          # (B, 2) f32
    small = small_ref[...]  # (8, 128) f32
    eps_b = eps_b_ref[...]  # (2, 128) f32

    # layer 1: nn.Linear(n_obs=2 -> 128). K=2, so two VPU broadcast FMAs (f32).
    h = x[:, 0:1] * small[0:1, :] + x[:, 1:2] * small[1:2, :] + small[2:3, :]
    h = jnp.maximum(h, 0.0)

    # layer 2: nn.Linear(128 -> 128) on MXU, bf16 operands / f32 accumulation.
    h = jnp.dot(h.astype(jnp.bfloat16), big_ref[0],
                preferred_element_type=jnp.float32) + small[3:4, :]
    h = jnp.maximum(h, 0.0)

    # layer 3: NoisyLinear(128 -> 128) via split-matmul identity:
    #   h @ (W + sigma*eps) = h @ W + h @ (sigma*eps).
    # sigma*eps stays bf16; no f32 copy of W is ever created.
    hb = h.astype(jnp.bfloat16)
    sig_eps3 = big_ref[3] * eps_w_ref[0]                      # (128,128) bf16
    b3_eff = small[4:5, :] + small[5:6, :] * eps_b[0:1, :]
    h = (jnp.dot(hb, big_ref[1], preferred_element_type=jnp.float32)
         + jnp.dot(hb, sig_eps3, preferred_element_type=jnp.float32)
         + b3_eff)
    h = jnp.maximum(h, 0.0)

    # layer 4: NoisyLinear(128 -> n_actions), zero-padded to a lane-dense
    # 128-wide output (padded sigma/bias/weight cols are zero -> padded lanes
    # are exactly 0). Same split-matmul identity, eps folded just-in-time.
    hb = h.astype(jnp.bfloat16)
    sig_eps4 = big_ref[4] * eps_w_ref[1]                      # (128,128) bf16
    b4_eff = small[6:7, :] + small[7:8, :] * eps_b[1:2, :]
    o_ref[...] = (jnp.dot(hb, big_ref[2], preferred_element_type=jnp.float32)
                  + jnp.dot(hb, sig_eps4, preferred_element_type=jnp.float32)
                  + b4_eff)


@functools.partial(jax.jit, static_argnames=("n_actions",))
def noisy_dqn_forward(x, small_slab, big_slab, noise_key, *, n_actions):
    """x: (B, 2) f32. noise_key: jax PRNG key (fresh each forward).
    Returns (B, n_actions) f32."""
    B = x.shape[0]
    kw, kb = jax.random.split(noise_key)
    # Fresh N(0,1) noise every forward, like epsilon_weight/_bias.normal_().
    # TODO(synk): sampled via jax.random (not torch's generator), so the noise
    # stream is statistically equivalent but not bit-identical to PyTorch.
    eps_w = jax.random.normal(kw, (2, HIDDEN, HIDDEN), jnp.float32).astype(jnp.bfloat16)
    eps_b = jax.random.normal(kb, (2, HIDDEN), jnp.float32)

    out = pl.pallas_call(
        noisy_dqn_kernel,
        out_shape=jax.ShapeDtypeStruct((B, HIDDEN), jnp.float32),
        in_specs=[
            pl.BlockSpec(memory_space=pltpu.MemorySpace.VMEM),   # x
            pl.BlockSpec(memory_space=pltpu.MemorySpace.VMEM),   # small slab (f32)
            pl.BlockSpec(memory_space=pltpu.MemorySpace.VMEM),   # big slab (bf16)
            pl.BlockSpec(memory_space=pltpu.MemorySpace.VMEM),   # eps_w (bf16)
            pl.BlockSpec(memory_space=pltpu.MemorySpace.VMEM),   # eps_b (f32)
        ],
        out_specs=pl.BlockSpec(memory_space=pltpu.MemorySpace.VMEM),
    )(x, small_slab, big_slab, eps_w, eps_b)
    return out[:, :n_actions]


def init_packed_params(key, n_obs, n_actions, hidden=HIDDEN):
    """PyTorch-style init (uniform +-sqrt(1/fan_in), sigma=SIGMA_INIT), then pack
    into the two kernel slabs (weights pre-transposed to (in, out))."""
    assert n_obs == N_OBS and hidden == HIDDEN and n_actions <= hidden
    ks = jax.random.split(key, 8)

    def lin_init(kw, kb, fan_in, fan_out):
        std = math.sqrt(1.0 / fan_in)
        w = jax.random.uniform(kw, (fan_out, fan_in), jnp.float32, -std, std)
        b = jax.random.uniform(kb, (fan_out,), jnp.float32, -std, std)
        return w, b

    w1, b1 = lin_init(ks[0], ks[1], n_obs, hidden)       # nn.Linear(n_obs, 128)
    w2, b2 = lin_init(ks[2], ks[3], hidden, hidden)      # nn.Linear(128, 128)
    w3, b3 = lin_init(ks[4], ks[5], hidden, hidden)      # NoisyLinear(128, 128)
    w4, b4 = lin_init(ks[6], ks[7], hidden, n_actions)   # NoisyLinear(128, n_actions)

    sigma_w3 = jnp.full((hidden, hidden), SIGMA_INIT, jnp.float32)
    sigma_b3 = jnp.full((hidden,), SIGMA_INIT, jnp.float32)
    sigma_w4 = jnp.full((n_actions, hidden), SIGMA_INIT, jnp.float32)
    sigma_b4 = jnp.full((n_actions,), SIGMA_INIT, jnp.float32)

    pad = hidden - n_actions

    # small slab (8, 128) f32.
    small_slab = jnp.stack([
        w1.T[0], w1.T[1],
        b1, b2, b3, sigma_b3,
        jnp.pad(b4, (0, pad)),
        jnp.pad(sigma_b4, (0, pad)),
    ]).astype(jnp.float32)

    # big slab (5, 128, 128) bf16 (pre-transposed; last layer zero-padded to
    # 128 outputs; sigma planes last so the fold sites index contiguously).
    w4T_pad = jnp.pad(w4.T, ((0, 0), (0, pad)))
    sigma_w4T_pad = jnp.pad(sigma_w4.T, ((0, 0), (0, pad)))
    big_slab = jnp.stack([w2.T, w3.T, w4T_pad, sigma_w3.T, sigma_w4T_pad]).astype(jnp.bfloat16)

    return small_slab, big_slab


if __name__ == "__main__":
    # MountainCar-v0: n_obs = 2, n_actions = 3
    n_obs, n_actions, batch = 2, 3, 8

    key = jax.random.PRNGKey(0)
    k_params, k_x, k_noise = jax.random.split(key, 3)

    small_slab, big_slab = init_packed_params(k_params, n_obs, n_actions)
    x = jax.random.normal(k_x, (batch, n_obs), jnp.float32)

    out = noisy_dqn_forward(x, small_slab, big_slab, k_noise, n_actions=n_actions)
    jax.block_until_ready(out)

    assert out.shape == (batch, n_actions)
    assert out.dtype == jnp.float32
    assert bool(jnp.all(jnp.isfinite(out)))
    print("KERNEL_OK")
</pallas_src>

<mosaic_0001>
module attributes {stable_mosaic.version = 11 : i64} {
  func.func @noisy_dqn_kernel(%arg0: memref<8x2xf32, #tpu.memory_space<vmem>>, %arg1: memref<8x128xf32, #tpu.memory_space<vmem>>, %arg2: memref<5x128x128xbf16, #tpu.memory_space<vmem>>, %arg3: memref<2x128x128xbf16, #tpu.memory_space<vmem>>, %arg4: memref<2x128xf32, #tpu.memory_space<vmem>>, %arg5: memref<8x128xf32, #tpu.memory_space<vmem>>) attributes {dimension_semantics = [], scalar_prefetch = 0 : i64, scratch_operands = 0 : i64, tpu.core_type = #tpu.core_type<tc>} {
    %c0 = arith.constant 0 : index
    %c0_0 = arith.constant 0 : index
    %0 = vector.load %arg0[%c0, %c0_0] : memref<8x2xf32, #tpu.memory_space<vmem>>, vector<8x2xf32>
    %c0_1 = arith.constant 0 : index
    %c0_2 = arith.constant 0 : index
    %1 = vector.load %arg1[%c0_1, %c0_2] : memref<8x128xf32, #tpu.memory_space<vmem>>, vector<8x128xf32>
    %c0_3 = arith.constant 0 : index
    %c0_4 = arith.constant 0 : index
    %2 = vector.load %arg4[%c0_3, %c0_4] : memref<2x128xf32, #tpu.memory_space<vmem>>, vector<2x128xf32>
    %3 = vector.extract_strided_slice %0 {offsets = [0, 0], sizes = [8, 1], strides = [1, 1]} : vector<8x2xf32> to vector<8x1xf32>
    %4 = vector.extract_strided_slice %1 {offsets = [0, 0], sizes = [1, 128], strides = [1, 1]} : vector<8x128xf32> to vector<1x128xf32>
    %5 = vector.broadcast %3 : vector<8x1xf32> to vector<8x128xf32>
    %6 = vector.broadcast %4 : vector<1x128xf32> to vector<8x128xf32>
    %7 = arith.mulf %5, %6 : vector<8x128xf32>
    %8 = vector.extract_strided_slice %0 {offsets = [0, 1], sizes = [8, 1], strides = [1, 1]} : vector<8x2xf32> to vector<8x1xf32>
    %9 = vector.extract_strided_slice %1 {offsets = [1, 0], sizes = [1, 128], strides = [1, 1]} : vector<8x128xf32> to vector<1x128xf32>
    %10 = vector.broadcast %8 : vector<8x1xf32> to vector<8x128xf32>
    %11 = vector.broadcast %9 : vector<1x128xf32> to vector<8x128xf32>
    %12 = arith.mulf %10, %11 : vector<8x128xf32>
    %13 = arith.addf %7, %12 : vector<8x128xf32>
    %14 = vector.extract_strided_slice %1 {offsets = [2, 0], sizes = [1, 128], strides = [1, 1]} : vector<8x128xf32> to vector<1x128xf32>
    %15 = vector.broadcast %14 : vector<1x128xf32> to vector<8x128xf32>
    %16 = arith.addf %13, %15 : vector<8x128xf32>
    %cst = arith.constant 0.000000e+00 : f32
    %17 = vector.broadcast %cst : f32 to vector<8x128xf32>
    %18 = arith.maximumf %16, %17 : vector<8x128xf32>
    %19 = arith.truncf %18 : vector<8x128xf32> to vector<8x128xbf16>
    %c0_5 = arith.constant 0 : index
    %c0_6 = arith.constant 0 : index
    %c0_7 = arith.constant 0 : index
    %20 = vector.load %arg2[%c0_5, %c0_6, %c0_7] : memref<5x128x128xbf16, #tpu.memory_space<vmem>>, vector<1x128x128xbf16>
    %21 = vector.shape_cast %20 : vector<1x128x128xbf16> to vector<128x128xbf16>
    %cst_8 = arith.constant dense<0.000000e+00> : vector<8x128xf32>
    %22 = tpu.matmul %19, %21, %cst_8 {dimension_numbers = #tpu.dot_dimension_numbers<[1], [0], [0], [1], [0, 0, 1, 1], [], []>} : vector<8x128xbf16>, vector<128x128xbf16>, vector<8x128xf32> -> vector<8x128xf32>
    %23 = vector.extract_strided_slice %1 {offsets = [3, 0], sizes = [1, 128], strides = [1, 1]} : vector<8x128xf32> to vector<1x128xf32>
    %24 = vector.broadcast %23 : vector<1x128xf32> to vector<8x128xf32>
    %25 = arith.addf %22, %24 : vector<8x128xf32>
    %cst_9 = arith.constant 0.000000e+00 : f32
    %26 = vector.broadcast %cst_9 : f32 to vector<8x128xf32>
    %27 = arith.maximumf %25, %26 : vector<8x128xf32>
    %28 = arith.truncf %27 : vector<8x128xf32> to vector<8x128xbf16>
    %c3 = arith.constant 3 : index
    %c0_10 = arith.constant 0 : index
    %c0_11 = arith.constant 0 : index
    %29 = vector.load %arg2[%c3, %c0_10, %c0_11] : memref<5x128x128xbf16, #tpu.memory_space<vmem>>, vector<1x128x128xbf16>
    %30 = vector.shape_cast %29 : vector<1x128x128xbf16> to vector<128x128xbf16>
    %c0_12 = arith.constant 0 : index
    %c0_13 = arith.constant 0 : index
    %c0_14 = arith.constant 0 : index
    %31 = vector.load %arg3[%c0_12, %c0_13, %c0_14] : memref<2x128x128xbf16, #tpu.memory_space<vmem>>, vector<1x128x128xbf16>
    %32 = vector.shape_cast %31 : vector<1x128x128xbf16> to vector<128x128xbf16>
    %33 = arith.mulf %30, %32 : vector<128x128xbf16>
    %34 = vector.extract_strided_slice %1 {offsets = [4, 0], sizes = [1, 128], strides = [1, 1]} : vector<8x128xf32> to vector<1x128xf32>
    %35 = vector.extract_strided_slice %1 {offsets = [5, 0], sizes = [1, 128], strides = [1, 1]} : vector<8x128xf32> to vector<1x128xf32>
    %36 = vector.extract_strided_slice %2 {offsets = [0, 0], sizes = [1, 128], strides = [1, 1]} : vector<2x128xf32> to vector<1x128xf32>
    %37 = arith.mulf %35, %36 : vector<1x128xf32>
    %38 = arith.addf %34, %37 : vector<1x128xf32>
    %c1 = arith.constant 1 : index
    %c0_15 = arith.constant 0 : index
    %c0_16 = arith.constant 0 : index
    %39 = vector.load %arg2[%c1, %c0_15, %c0_16] : memref<5x128x128xbf16, #tpu.memory_space<vmem>>, vector<1x128x128xbf16>
    %40 = vector.shape_cast %39 : vector<1x128x128xbf16> to vector<128x128xbf16>
    %cst_17 = arith.constant dense<0.000000e+00> : vector<8x128xf32>
    %41 = tpu.matmul %28, %40, %cst_17 {dimension_numbers = #tpu.dot_dimension_numbers<[1], [0], [0], [1], [0, 0, 1, 1], [], []>} : vector<8x128xbf16>, vector<128x128xbf16>, vector<8x128xf32> -> vector<8x128xf32>
    %cst_18 = arith.constant dense<0.000000e+00> : vector<8x128xf32>
    %42 = tpu.matmul %28, %33, %cst_18 {dimension_numbers = #tpu.dot_dimension_numbers<[1], [0], [0], [1], [0, 0, 1, 1], [], []>} : vector<8x128xbf16>, vector<128x128xbf16>, vector<8x128xf32> -> vector<8x128xf32>
    %43 = arith.addf %41, %42 : vector<8x128xf32>
    %44 = vector.broadcast %38 : vector<1x128xf32> to vector<8x128xf32>
    %45 = arith.addf %43, %44 : vector<8x128xf32>
    %cst_19 = arith.constant 0.000000e+00 : f32
    %46 = vector.broadcast %cst_19 : f32 to vector<8x128xf32>
    %47 = arith.maximumf %45, %46 : vector<8x128xf32>
    %48 = arith.truncf %47 : vector<8x128xf32> to vector<8x128xbf16>
    %c4 = arith.constant 4 : index
    %c0_20 = arith.constant 0 : index
    %c0_21 = arith.constant 0 : index
    %49 = vector.load %arg2[%c4, %c0_20, %c0_21] : memref<5x128x128xbf16, #tpu.memory_space<vmem>>, vector<1x128x128xbf16>
    %50 = vector.shape_cast %49 : vector<1x128x128xbf16> to vector<128x128xbf16>
    %c1_22 = arith.constant 1 : index
    %c0_23 = arith.constant 0 : index
    %c0_24 = arith.constant 0 : index
    %51 = vector.load %arg3[%c1_22, %c0_23, %c0_24] : memref<2x128x128xbf16, #tpu.memory_space<vmem>>, vector<1x128x128xbf16>
    %52 = vector.shape_cast %51 : vector<1x128x128xbf16> to vector<128x128xbf16>
    %53 = arith.mulf %50, %52 : vector<128x128xbf16>
    %54 = vector.extract_strided_slice %1 {offsets = [6, 0], sizes = [1, 128], strides = [1, 1]} : vector<8x128xf32> to vector<1x128xf32>
    %55 = vector.extract_strided_slice %1 {offsets = [7, 0], sizes = [1, 128], strides = [1, 1]} : vector<8x128xf32> to vector<1x128xf32>
    %56 = vector.extract_strided_slice %2 {offsets = [1, 0], sizes = [1, 128], strides = [1, 1]} : vector<2x128xf32> to vector<1x128xf32>
    %57 = arith.mulf %55, %56 : vector<1x128xf32>
    %58 = arith.addf %54, %57 : vector<1x128xf32>
    %c2 = arith.constant 2 : index
    %c0_25 = arith.constant 0 : index
    %c0_26 = arith.constant 0 : index
    %59 = vector.load %arg2[%c2, %c0_25, %c0_26] : memref<5x128x128xbf16, #tpu.memory_space<vmem>>, vector<1x128x128xbf16>
    %60 = vector.shape_cast %59 : vector<1x128x128xbf16> to vector<128x128xbf16>
    %cst_27 = arith.constant dense<0.000000e+00> : vector<8x128xf32>
    %61 = tpu.matmul %48, %60, %cst_27 {dimension_numbers = #tpu.dot_dimension_numbers<[1], [0], [0], [1], [0, 0, 1, 1], [], []>} : vector<8x128xbf16>, vector<128x128xbf16>, vector<8x128xf32> -> vector<8x128xf32>
    %cst_28 = arith.constant dense<0.000000e+00> : vector<8x128xf32>
    %62 = tpu.matmul %48, %53, %cst_28 {dimension_numbers = #tpu.dot_dimension_numbers<[1], [0], [0], [1], [0, 0, 1, 1], [], []>} : vector<8x128xbf16>, vector<128x128xbf16>, vector<8x128xf32> -> vector<8x128xf32>
    %63 = arith.addf %61, %62 : vector<8x128xf32>
    %64 = vector.broadcast %58 : vector<1x128xf32> to vector<8x128xf32>
    %65 = arith.addf %63, %64 : vector<8x128xf32>
    %c0_29 = arith.constant 0 : index
    %c0_30 = arith.constant 0 : index
    %66 = vector.load %arg5[%c0_29, %c0_30] : memref<8x128xf32, #tpu.memory_space<vmem>>, vector<8x128xf32>
    tpu.vector_store %arg5[%c0_29, %c0_30], %65 {strides = array<i32>} : memref<8x128xf32, #tpu.memory_space<vmem>>, vector<8x128xf32>,
    return
  }
}

</mosaic_0001>

<bundles_post_ra>
// kernel: noisy_dqn_forward.3
= control target key start
LH: loop header
LB: loop body
LE: loop exit
PB: predicated region body
PF: predicated region fallthrough
CT: control target
= control target key end

     0   :  { %v973_v0 = vmov 0   ;;  %v974_v2 = vmov 0.0   ;;  %v975_v5 = vmov 1   ;;  %vm976_vm0 = vmmov 0   ;;  %s1351_s0 = inlined_call_operand.vmem [shape: f32[8,2], index: 0, kind: input, shape index: {}]   ;;  %s1352_s2 = inlined_call_operand.vmem [shape: bf16[5,128,128], index: 2, kind: input, shape index: {}]   ;;  %s1353_s3 = inlined_call_operand.vmem [shape: bf16[2,128,128], index: 3, kind: input, shape index: {}]   ;;  %s1354_s1 = inlined_call_operand.vmem [shape: f32[8,128], index: 1, kind: input, shape index: {}]   ;;  %s1355_s4 = inlined_call_operand.vmem [shape: f32[2,128], index: 4, kind: input, shape index: {}]   ;;  %s1356_s5 = inlined_call_operand.vmem [shape: f32[8,128], index: 5, kind: output, shape index: {}]  }
   0x1   :  { %947 = vset.pattern.permute.xlu0 %v973_v0  ;;  %v21_v1 = vld [vmem:[%s1351_s0] sm:$0xff]  ;;  %843 = vmatprep.subr.bf16.mxu0 %v974_v2  ;;  %v950_v4 = vld [vmem:[%s1352_s2 + $0x8] sm:$0xff]   ;;  %v951_v6 = vld [vmem:[%s1352_s2 + $0x10] sm:$0xff]   ;;  %v29_v54 = vlaneseq }
   0x2   :  { %26 = vperm.xlu0 %947, %v21_v1   ;;  %v949_v3 = vld [vmem:[%s1352_s2] sm:$0xff]   ;;  %863 = vmatprep.subr.bf16.mxu1 %v974_v2  ;;  %v952_v7 = vld [vmem:[%s1352_s2 + $0x18] sm:$0xff]   ;;  %v688_v15 = vld [vmem:[%s1352_s2 + $0xc8] sm:$0xf] }
   0x3   :  { %844 = vmatpush3.bf16.msra.mxu0 %v949_v3  ;;  %859 = vmatprep.mubr.msk.bf16.mxu0 %vm976_vm0, %v974_v2  ;;  %v953_v8 = vld [vmem:[%s1352_s2 + $0x20] sm:$0xff]   ;;  %v689_v16 = vld [vmem:[%s1352_s2 + $0xcc] sm:$0xf]  ;;  %v180_v17 = vld [vmem:[%s1353_s3 + $0x8] sm:$0xf]  ;;  %v1126_v55 = vshrl.u32 %v29_v54, 7 }
   0x4   :  { %845 = vmatprep.subr.bf16.mxu0 %v974_v2  ;;  %879 = vmatprep.mubr.msk.bf16.mxu1 %vm976_vm0, %v974_v2  ;;  %v686_v9 = vld [vmem:[%s1352_s2 + $0xc0] sm:$0xf]  ;;  %v687_v10 = vld [vmem:[%s1352_s2 + $0xc4] sm:$0xf]  ;;  %v954_v18 = vld [vmem:[%s1352_s2 + $0x28] sm:$0xff]   ;;  %v196_v20 = vmul.bf16 %v688_v15, %v180_v17 }
   0x5   :  { %v178_v11 = vld [vmem:[%s1353_s3] sm:$0xf]  ;;  %v179_v12 = vld [vmem:[%s1353_s3 + $0x4] sm:$0xf]  ;;  %v181_v19 = vld [vmem:[%s1353_s3 + $0xc] sm:$0xf] }
   0x6   :  { %948 = vset.pattern.permute.xlu0 %v975_v5  ;;  %v194_v13 = vmul.bf16 %v686_v9, %v178_v11  ;;  %v195_v14 = vmul.bf16 %v687_v10, %v179_v12  ;;  %v197_v22 = vmul.bf16 %v689_v16, %v181_v19  ;;  %v690_v24 = vld [vmem:[%s1352_s2 + $0xd0] sm:$0xf]  ;;  %v691_v25 = vld [vmem:[%s1352_s2 + $0xd4] sm:$0xf]  ;;  %v692_v32 = vld [vmem:[%s1352_s2 + $0xd8] sm:$0xf] }
   0x7   :  { %35 = vperm.xlu0 %948, %v21_v1   ;;  %846 = vmatpush3.bf16.msra.mxu0 %v950_v4  ;;  %v182_v26 = vld [vmem:[%s1353_s3 + $0x10] sm:$0xf]  ;;  %v183_v28 = vld [vmem:[%s1353_s3 + $0x14] sm:$0xf]  ;;  %v693_v33 = vld [vmem:[%s1352_s2 + $0xdc] sm:$0xf] }
   0x8   :  { %847 = vmatprep.subr.bf16.mxu0 %v974_v2  ;;  %v718_v21 = vcombine.low %v194_v13, %v195_v14  ;;  %v719_v23 = vcombine.low %v196_v20, %v197_v22  ;;  %v955_v27 = vld [vmem:[%s1352_s2 + $0x30] sm:$0xff]   ;;  %v198_v29 = vmul.bf16 %v690_v24, %v182_v26  ;;  %v199_v30 = vmul.bf16 %v691_v25, %v183_v28  ;;  %v184_v34 = vld [vmem:[%s1353_s3 + $0x18] sm:$0xf]  ;;  %v185_v36 = vld [vmem:[%s1353_s3 + $0x1c] sm:$0xf] }
   0x9   :  { %v956_v35 = vld [vmem:[%s1352_s2 + $0x38] sm:$0xff]   ;;  %v200_v37 = vmul.bf16 %v692_v32, %v184_v34  ;;  %v201_v38 = vmul.bf16 %v693_v33, %v185_v36  ;;  %v694_v40 = vld [vmem:[%s1352_s2 + $0xe0] sm:$0xf]  ;;  %v695_v41 = vld [vmem:[%s1352_s2 + $0xe4] sm:$0xf]  ;;  %v31_v56 = vsub.s32 0, %v1126_v55 }
   0xa   :  { %864 = vmatpush3.bf16.msra.mxu1 %v718_v21  ;;  %v720_v31 = vcombine.low %v198_v29, %v199_v30  ;;  %v186_v42 = vld [vmem:[%s1353_s3 + $0x20] sm:$0xf]  ;;  %v187_v43 = vld [vmem:[%s1353_s3 + $0x24] sm:$0xf]  ;;  %v696_v47 = vld [vmem:[%s1352_s2 + $0xe8] sm:$0xf] }
   0xb   :  { %848 = vmatpush3.bf16.msra.mxu0 %v951_v6  ;;  %865 = vmatprep.subr.bf16.mxu1 %v974_v2  ;;  %v721_v39 = vcombine.low %v200_v37, %v201_v38  ;;  %v202_v44 = vmul.bf16 %v694_v40, %v186_v42  ;;  %v203_v45 = vmul.bf16 %v695_v41, %v187_v43  ;;  %v697_v48 = vld [vmem:[%s1352_s2 + $0xec] sm:$0xf]  ;;  %v188_v49 = vld [vmem:[%s1353_s3 + $0x28] sm:$0xf]  ;;  %v40_v57 = vsub.s32 1, %v1126_v55  ;;  %v1133_v58 = vld [vmem:[%s1354_s1] sm:$0xff] }
   0xc   :  { %849 = vmatprep.subr.bf16.mxu0 %v974_v2  ;;  %v189_v50 = vld [vmem:[%s1353_s3 + $0x2c] sm:$0xf]  ;;  %v204_v51 = vmul.bf16 %v696_v47, %v188_v49  ;;  %v32_v60 = vrot.slane %v1133_v58, %v31_v56  ;;  %v46_v62 = vsub.s32 2, %v1126_v55  ;;  %v959_v10 = vld [vmem:[%s1352_s2 + $0x50] sm:$0xff]   ;;  %v960_v11 = vld [vmem:[%s1352_s2 + $0x58] sm:$0xff]   ;;  %v69_v30 = vsub.s32 3, %v1126_v55 }
   0xd   :  { %v722_v46 = vcombine.low %v202_v44, %v203_v45  ;;  %v205_v52 = vmul.bf16 %v697_v48, %v189_v50  ;;  %v41_v61 = vrot.slane %v1133_v58, %v40_v57  ;;  %v958_v9 = vld [vmem:[%s1352_s2 + $0x48] sm:$0xff]   ;;  %v961_v12 = vld [vmem:[%s1352_s2 + $0x60] sm:$0xff]   ;;  %v698_v14 = vld [vmem:[%s1352_s2 + $0xf0] sm:$0xf] }
   0xe   :  { %866 = vmatpush3.bf16.msra.mxu1 %v719_v23  ;;  %v47_v1 = vrot.slane %v1133_v58, %v46_v62  ;;  %v962_v13 = vld [vmem:[%s1352_s2 + $0x68] sm:$0xff]   ;;  %v699_v15 = vld [vmem:[%s1352_s2 + $0xf4] sm:$0xf]  ;;  %v190_v16 = vld [vmem:[%s1353_s3 + $0x30] sm:$0xf]  ;;  %v70_v32 = vrot.slane %v1133_v58, %v69_v30 }
   0xf   :  { %850 = vmatpush3.bf16.msra.mxu0 %v952_v7  ;;  %867 = vmatprep.subr.bf16.mxu1 %v974_v2  ;;  %v723_v53 = vcombine.low %v204_v51, %v205_v52  ;;  %v957_v7 = vld [vmem:[%s1352_s2 + $0x40] sm:$0xff]   ;;  %v191_v17 = vld [vmem:[%s1353_s3 + $0x34] sm:$0xf]  ;;  %v700_v22 = vld [vmem:[%s1352_s2 + $0xf8] sm:$0xf] }
  0x10   :  { %851 = vmatprep.subr.bf16.mxu0 %v974_v2  ;;  %v207_v19 = vmul.bf16 %v699_v15, %v191_v17  ;;  %v963_v20 = vld [vmem:[%s1352_s2 + $0x70] sm:$0xff]   ;;  %v701_v23 = vld [vmem:[%s1352_s2 + $0xfc] sm:$0xf]  ;;  %v192_v24 = vld [vmem:[%s1353_s3 + $0x38] sm:$0xf] }
  0x11   :  { %v193_v25 = vld [vmem:[%s1353_s3 + $0x3c] sm:$0xf]  ;;  %v208_v26 = vmul.bf16 %v700_v22, %v192_v24  ;;  %v735_v33 = vld [vmem:[%s1352_s2 + $0x104] sm:$0xf]  ;;  %v750_v34 = vld [vmem:[%s1353_s3 + $0x40] sm:$0xf] }
  0x12   :  { %868 = vmatpush3.bf16.msra.mxu1 %v720_v31  ;;  %v964_v28 = vld [vmem:[%s1352_s2 + $0x78] sm:$0xff]   ;;  %v734_v31 = vld [vmem:[%s1352_s2 + $0x100] sm:$0xf]  ;;  %v737_v40 = vld [vmem:[%s1352_s2 + $0x10c] sm:$0xf] }
  0x13   :  { %852 = vmatpush3.bf16.msra.mxu0 %v953_v8  ;;  %869 = vmatprep.subr.bf16.mxu1 %v974_v2  ;;  %v452_v37 = vmul.bf16 %v750_v34, %v734_v31  ;;  %v752_v43 = vld [vmem:[%s1353_s3 + $0x48] sm:$0xf]  ;;  %v753_v44 = vld [vmem:[%s1353_s3 + $0x4c] sm:$0xf]  ;;  %v965_v49 = vld [vmem:[%s1352_s2 + $0x80] sm:$0xff]  }
  0x14   :  { %853 = vmatprep.subr.bf16.mxu0 %v974_v2  ;;  %v455_v51 = vmul.bf16 %v753_v44, %v737_v40  ;;  %v738_v52 = vld [vmem:[%s1352_s2 + $0x110] sm:$0xf]  ;;  %v739_v54 = vld [vmem:[%s1352_s2 + $0x114] sm:$0xf]  ;;  %v745_v17 = vld [vmem:[%s1352_s2 + $0x12c] sm:$0xf] }
  0x15   :  { %v754_v56 = vld [vmem:[%s1353_s3 + $0x50] sm:$0xf]  ;;  %v755_v57 = vld [vmem:[%s1353_s3 + $0x54] sm:$0xf]  ;;  %v748_v34 = vld [vmem:[%s1352_s2 + $0x138] sm:$0xf] }
  0x16   :  { %870 = vmatpush3.bf16.msra.mxu1 %v721_v39  ;;  %v736_v39 = vld [vmem:[%s1352_s2 + $0x108] sm:$0xf]  ;;  %v457_v62 = vmul.bf16 %v755_v57, %v739_v54  ;;  %v972_v40 = vld [vmem:[%s1352_s2 + $0xb8] sm:$0xff]  }
  0x17   :  { %854 = vmatpush3.bf16.msra.mxu0 %v954_v18  ;;  %871 = vmatprep.subr.bf16.mxu1 %v974_v2  ;;  %v206_v18 = vmul.bf16 %v698_v14, %v190_v16  ;;  %v454_v50 = vmul.bf16 %v752_v43, %v736_v39  ;;  %v744_v16 = vld [vmem:[%s1352_s2 + $0x128] sm:$0xf] }
  0x18   :  { %855 = vmatprep.subr.bf16.mxu0 %v974_v2 }
  0x19   :  { %v724_v21 = vcombine.low %v206_v18, %v207_v19  ;;  %v760_v18 = vld [vmem:[%s1353_s3 + $0x68] sm:$0xf]  ;;  %v761_v19 = vld [vmem:[%s1353_s3 + $0x6c] sm:$0xf] }
  0x1a   :  { %872 = vmatpush3.bf16.msra.mxu1 %v722_v46  ;;  %v462_v22 = vmul.bf16 %v760_v18, %v744_v16 }
  0x1b   :  { %856 = vmatpush3.bf16.msra.mxu0 %v955_v27  ;;  %873 = vmatprep.subr.bf16.mxu1 %v974_v2  ;;  %v209_v27 = vmul.bf16 %v701_v23, %v193_v25  ;;  %v463_v23 = vmul.bf16 %v761_v19, %v745_v17  ;;  %v970_v25 = vld [vmem:[%s1352_s2 + $0xa8] sm:$0xff]  }
  0x1c   :  { %857 = vmatprep.subr.bf16.mxu0 %v974_v2 }
  0x1d   :  { %v725_v29 = vcombine.low %v208_v26, %v209_v27  ;;  %v787_v24 = vcombine.low %v462_v22, %v463_v23  ;;  %v746_v26 = vld [vmem:[%s1352_s2 + $0x130] sm:$0xf]  ;;  %v747_v27 = vld [vmem:[%s1352_s2 + $0x134] sm:$0xf] }
  0x1e   :  { %874 = vmatpush3.bf16.msra.mxu1 %v723_v53 }
  0x1f   :  { %858 = vmatpush3.bf16.msra.mxu0 %v956_v35  ;;  %875 = vmatprep.subr.bf16.mxu1 %v974_v2  ;;  %v751_v35 = vld [vmem:[%s1353_s3 + $0x44] sm:$0xf] }
  0x20   :  { %883 = vmatprep.subr.bf16.mxu0 %v974_v2  ;;  %v453_v38 = vmul.bf16 %v751_v35, %v735_v33  ;;  %v749_v35 = vld [vmem:[%s1352_s2 + $0x13c] sm:$0xf] }
  0x22   :  { %876 = vmatpush3.bf16.msra.mxu1 %v724_v21  ;;  %v782_v48 = vcombine.low %v452_v37, %v453_v38  ;;  %v969_v21 = vld [vmem:[%s1352_s2 + $0xa0] sm:$0xff]   ;;  %v765_v37 = vld [vmem:[%s1353_s3 + $0x7c] sm:$0xf] }
  0x23   :  { %877 = vmatprep.subr.bf16.mxu1 %v974_v2  ;;  %v467_v39 = vmul.bf16 %v765_v37, %v749_v35 }
  0x26   :  { %878 = vmatpush3.bf16.msra.mxu1 %v725_v29  ;;  %v763_v29 = vld [vmem:[%s1353_s3 + $0x74] sm:$0xf] }
  0x27   :  { %903 = vmatprep.subr.bf16.mxu1 %v974_v2  ;;  %v465_v31 = vmul.bf16 %v763_v29, %v747_v27 }
  0x81   :  { %v27_v59 = vpop.permute.xlu0 %26 }
  0x82   :  { %v33_v0 = vmul.f32 %v32_v60, %v27_v59  ;;  %v783_v59 = vcombine.low %v454_v50, %v455_v51  ;;  %v966_v60 = vld [vmem:[%s1352_s2 + $0x88] sm:$0xff]  }
  0x86   :  { %v36_v63 = vpop.permute.xlu0 %35 }
  0x87   :  { %v42_v3 = vmul.f32 %v41_v61, %v36_v63  ;;  %v456_v61 = vmul.bf16 %v754_v56, %v738_v52  ;;  %v740_v63 = vld [vmem:[%s1352_s2 + $0x118] sm:$0xf] }
  0x89   :  { %v43_v4 = vadd.f32 %v42_v3, %v33_v0  ;;  %v741_v0 = vld [vmem:[%s1352_s2 + $0x11c] sm:$0xf] }
  0x8a   :  { %v757_v3 = vld [vmem:[%s1353_s3 + $0x5c] sm:$0xf] }
  0x8b   :  { %v48_v5 = vadd.f32 %v47_v1, %v43_v4  ;;  %v756_v1 = vld [vmem:[%s1353_s3 + $0x58] sm:$0xf]  ;;  %v784_v4 = vcombine.low %v456_v61, %v457_v62 }
  0x8d   :  { %v49_v6 = vmax.f32 %v48_v5, 0.0  ;;  %v967_v5 = vld [vmem:[%s1352_s2 + $0x90] sm:$0xff]  }
  0x8f   :  { %v50_v8 = vpack.c.bf16 %v49_v6, %v49_v6  ;;  %v458_v6 = vmul.bf16 %v756_v1, %v740_v63 }
  0x91   :  { %860 = vmatmul.mubr.bf16.vlgmr.msra.gmra.mrb[0].mxu0 %v50_v8  ;;  %v742_v8 = vld [vmem:[%s1352_s2 + $0x120] sm:$0xf] }
  0x92   :  { %884 = vmatpush3.bf16.msra.mxu0 %v957_v7  ;;  %899 = vmatprep.mubr.msk.bf16.mxu0 %vm976_vm0, %v974_v2  ;;  %v459_v7 = vmul.bf16 %v757_v3, %v741_v0  ;;  %v670_v3 = vsub.s32 6, %v1126_v55 }
  0x93   :  { %885 = vmatprep.subr.bf16.mxu0 %v974_v2 }
  0x96   :  { %886 = vmatpush3.bf16.msra.mxu0 %v958_v9  ;;  %v743_v9 = vld [vmem:[%s1352_s2 + $0x124] sm:$0xf] }
  0x97   :  { %887 = vmatprep.subr.bf16.mxu0 %v974_v2 }
  0x9a   :  { %888 = vmatpush3.bf16.msra.mxu0 %v959_v10  ;;  %v758_v10 = vld [vmem:[%s1353_s3 + $0x60] sm:$0xf] }
  0x9b   :  { %889 = vmatprep.subr.bf16.mxu0 %v974_v2  ;;  %v460_v14 = vmul.bf16 %v758_v10, %v742_v8 }
  0x9e   :  { %890 = vmatpush3.bf16.msra.mxu0 %v960_v11  ;;  %v759_v11 = vld [vmem:[%s1353_s3 + $0x64] sm:$0xf] }
  0x9f   :  { %891 = vmatprep.subr.bf16.mxu0 %v974_v2  ;;  %v461_v15 = vmul.bf16 %v759_v11, %v743_v9 }
  0xa2   :  { %892 = vmatpush3.bf16.msra.mxu0 %v961_v12  ;;  %v785_v12 = vcombine.low %v458_v6, %v459_v7 }
  0xa3   :  { %893 = vmatprep.subr.bf16.mxu0 %v974_v2 }
  0xa6   :  { %894 = vmatpush3.bf16.msra.mxu0 %v962_v13  ;;  %v968_v13 = vld [vmem:[%s1352_s2 + $0x98] sm:$0xff]  }
  0xa7   :  { %895 = vmatprep.subr.bf16.mxu0 %v974_v2 }
  0xaa   :  { %896 = vmatpush3.bf16.msra.mxu0 %v963_v20  ;;  %v786_v20 = vcombine.low %v460_v14, %v461_v15 }
  0xab   :  { %897 = vmatprep.subr.bf16.mxu0 %v974_v2 }
  0xae   :  { %898 = vmatpush3.bf16.msra.mxu0 %v964_v28  ;;  %v762_v28 = vld [vmem:[%s1353_s3 + $0x70] sm:$0xf] }
  0xaf   :  { %923 = vmatprep.subr.bf16.mxu0 %v974_v2  ;;  %v464_v30 = vmul.bf16 %v762_v28, %v746_v26 }
  0xb1   :  { %v788_v33 = vcombine.low %v464_v30, %v465_v31 }
 0x164   :  { %v153_v36 = vpop.f32.mrb[0].mxu0 }
 0x165   :  { %v154_v41 = vadd.f32 %v153_v36, %v70_v32  ;;  %v861_v42 = vpop.f32.mrb[1].mxu0  ;;  %v971_v32 = vld [vmem:[%s1352_s2 + $0xb0] sm:$0xff]   ;;  %v764_v36 = vld [vmem:[%s1353_s3 + $0x78] sm:$0xf] }
 0x166   :  { %v156_v45 = vpop.f32.mrb[2].mxu0  ;;  %v466_v38 = vmul.bf16 %v764_v36, %v748_v34  ;;  %v23_v42 = vld [vmem:[%s1355_s4] sm:$0x3] }
 0x167   :  { %v159_v46 = vmax.f32 %v154_v41, 0.0  ;;  %v862_v47 = vpop.f32.mrb[3].mxu0  ;;  %v211_v43 = vrot.slane %v23_v42, 3  ;;  %v468_v62 = vrot.slane %v23_v42, 2 }
 0x168   :  { %v789_v41 = vcombine.low %v466_v38, %v467_v39  ;;  %v413_v47 = vsub.s32 4, %v1126_v55 }
 0x169   :  { %v160_v53 = vpack.c.bf16 %v159_v46, %v159_v46  ;;  %v213_v44 = vmul.f32 %v211_v43, %v1133_v58  ;;  %v470_v63 = vmul.f32 %v468_v62, %v1133_v58 }
 0x16b   :  { %880 = vmatmul.mubr.bf16.vlgmr.msra.gmra.mrb[0].mxu1 %v160_v53  ;;  %900 = vmatmul.mubr.bf16.vlgmr.msra.gmra.mrb[4].mxu0 %v160_v53  ;;  %v215_v45 = vrot.slane %v213_v44, 1  ;;  %v472_v0 = vrot.slane %v470_v63, 1 }
 0x16c   :  { %904 = vmatpush3.bf16.msra.mxu1 %v782_v48  ;;  %924 = vmatpush3.bf16.msra.mxu0 %v965_v49 }
 0x16d   :  { %905 = vmatprep.subr.bf16.mxu1 %v974_v2  ;;  %925 = vmatprep.subr.bf16.mxu0 %v974_v2  ;;  %v217_v46 = vadd.f32 %v215_v45, %v1133_v58  ;;  %v474_v1 = vadd.f32 %v472_v0, %v1133_v58 }
 0x16e   :  { %919 = vmatprep.mubr.msk.bf16.mxu1 %vm976_vm0, %v974_v2  ;;  %939 = vmatprep.mubr.msk.bf16.mxu0 %vm976_vm0, %v974_v2 }
 0x170   :  { %906 = vmatpush3.bf16.msra.mxu1 %v783_v59  ;;  %926 = vmatpush3.bf16.msra.mxu0 %v966_v60 }
 0x171   :  { %907 = vmatprep.subr.bf16.mxu1 %v974_v2  ;;  %927 = vmatprep.subr.bf16.mxu0 %v974_v2 }
 0x174   :  { %908 = vmatpush3.bf16.msra.mxu1 %v784_v4  ;;  %928 = vmatpush3.bf16.msra.mxu0 %v967_v5  ;;  %v671_v4 = vrot.slane %v474_v1, %v670_v3 }
 0x175   :  { %909 = vmatprep.subr.bf16.mxu1 %v974_v2  ;;  %929 = vmatprep.subr.bf16.mxu0 %v974_v2 }
 0x178   :  { %910 = vmatpush3.bf16.msra.mxu1 %v785_v12  ;;  %930 = vmatpush3.bf16.msra.mxu0 %v968_v13 }
 0x179   :  { %911 = vmatprep.subr.bf16.mxu1 %v974_v2  ;;  %931 = vmatprep.subr.bf16.mxu0 %v974_v2 }
 0x17c   :  { %912 = vmatpush3.bf16.msra.mxu1 %v786_v20  ;;  %932 = vmatpush3.bf16.msra.mxu0 %v969_v21 }
 0x17d   :  { %913 = vmatprep.subr.bf16.mxu1 %v974_v2  ;;  %933 = vmatprep.subr.bf16.mxu0 %v974_v2 }
 0x180   :  { %914 = vmatpush3.bf16.msra.mxu1 %v787_v24  ;;  %934 = vmatpush3.bf16.msra.mxu0 %v970_v25 }
 0x181   :  { %915 = vmatprep.subr.bf16.mxu1 %v974_v2  ;;  %935 = vmatprep.subr.bf16.mxu0 %v974_v2 }
 0x184   :  { %936 = vmatpush3.bf16.msra.mxu0 %v971_v32  ;;  %916 = vmatpush3.bf16.msra.mxu1 %v788_v33 }
 0x185   :  { %937 = vmatprep.subr.bf16.mxu0 %v974_v2  ;;  %917 = vmatprep.subr.bf16.mxu1 %v974_v2  ;;  %v414_v2 = vrot.slane %v217_v46, %v413_v47 }
 0x188   :  { %938 = vmatpush3.bf16.msra.mxu0 %v972_v40  ;;  %918 = vmatpush3.bf16.msra.mxu1 %v789_v41 }
 0x23e   :  { %v317_v48 = vpop.f32.mrb[0].mxu1  ;;  %v405_v49 = vpop.f32.mrb[4].mxu0 }
 0x23f   :  { %v406_v50 = vadd.f32 %v405_v49, %v317_v48  ;;  %v881_v51 = vpop.f32.mrb[1].mxu1  ;;  %v901_v52 = vpop.f32.mrb[5].mxu0 }
 0x240   :  { %v320_v53 = vpop.f32.mrb[2].mxu1  ;;  %v408_v54 = vpop.f32.mrb[6].mxu0 }
 0x241   :  { %v415_v56 = vadd.f32 %v414_v2, %v406_v50  ;;  %v882_v57 = vpop.f32.mrb[3].mxu1  ;;  %v902_v59 = vpop.f32.mrb[7].mxu0 }
 0x243   :  { %v416_v60 = vmax.f32 %v415_v56, 0.0 }
 0x245   :  { %v417_v61 = vpack.c.bf16 %v416_v60, %v416_v60 }
 0x247   :  { %920 = vmatmul.mubr.bf16.vlgmr.msra.gmra.mrb[4].mxu1 %v417_v61  ;;  %940 = vmatmul.mubr.bf16.vlgmr.msra.gmra.mrb[8].mxu0 %v417_v61 }
 0x31a   :  { %v574_v5 = vpop.f32.mrb[4].mxu1  ;;  %v662_v6 = vpop.f32.mrb[8].mxu0 }
 0x31b   :  { %v663_v7 = vadd.f32 %v662_v6, %v574_v5  ;;  %v921_v8 = vpop.f32.mrb[5].mxu1  ;;  %v941_v9 = vpop.f32.mrb[9].mxu0 }
 0x31c   :  { %v577_v10 = vpop.f32.mrb[6].mxu1  ;;  %v665_v11 = vpop.f32.mrb[10].mxu0 }
 0x31d   :  { %v672_v12 = vadd.f32 %v671_v4, %v663_v7  ;;  %v922_v13 = vpop.f32.mrb[7].mxu1  ;;  %v942_v14 = vpop.f32.mrb[11].mxu0 }
 0x31f   :  { %673 = vst [vmem:[%s1356_s5] sm:$0xff] %v672_v12 }

</bundles_post_ra>
